<compile_context>
chip_gen: v5e
topology: v5e:2x2
jax: 0.10.0
libtpu: 0.0.40
codegen_flags: <defaults>
</compile_context>

<pallas_src>
import functools

import jax
import jax.numpy as jnp
from jax.experimental import pallas as pl
from jax.experimental.pallas import tpu as pltpu


_LANE = 128
_SUBLANE = 8


def _round_up(x: int, m: int) -> int:
    return (x + m - 1) // m * m


# ---------------------------------------------------------------------------
# Parameters
# ---------------------------------------------------------------------------

def init_srnn_params(key, input_size, hidden_size, num_layer, output_size):
    """Deterministic f32 parameters.

    Weights are stored transposed from PyTorch as (in_features, out_features)
    so the math is y = x @ W + b; biases are (1, out_features).
    """
    keys = jax.random.split(key, 2 * (num_layer + 2))
    k_it = iter(keys)

    def linear(kw, kb, fan_in, fan_out):
        bound = 1.0 / float(fan_in) ** 0.5
        w = jax.random.uniform(kw, (fan_in, fan_out), jnp.float32, -bound, bound)
        b = jax.random.uniform(kb, (1, fan_out), jnp.float32, -bound, bound)
        return w, b

    gat_w, gat_b = linear(next(k_it), next(k_it), input_size, hidden_size)

    fr = []
    fan_in = input_size
    for _ in range(num_layer):
        w, b = linear(next(k_it), next(k_it), fan_in, hidden_size)
        fr.append((w, b))
        fan_in = hidden_size

    last_w, last_b = linear(next(k_it), next(k_it), hidden_size, output_size)
    return {"gat_w": gat_w, "gat_b": gat_b, "fr": fr,
            "last_w": last_w, "last_b": last_b}


def pack_srnn_params(params, *, input_size, hidden_size, num_layer, output_size,
                     matmul_dtype=jnp.bfloat16):
    """Prepares kernel-ready parameters.

    - Pads feature dims to multiples of 128 (lane width).
    - Casts matmul weights to bf16 (biases stay f32, added post-accumulation).
    - Fuses the gate branch with the first fr layer: [W0 | Wg] along the output
      dim so both pre-activations come from one wide MXU push on the shared x.
    - Stacks fr layers 1..L-1 into a single (L-1, H_p, H_p) weight tensor and a
      (L-1, 1, H_p) bias tensor (fewer pallas_call operands / DMAs).
    - Provides a (1, H_p) lane mask to zero padded feature lanes of h_new.
    - Does NOT materialize wp: the kernel applies the cyclic shift in-place.
    """
    in_p = _round_up(input_size, _LANE)
    hid_p = _round_up(hidden_size, _LANE)
    out_p = _round_up(output_size, _LANE)

    def pad2(w, rows, cols):
        return jnp.pad(w, ((0, rows - w.shape[0]), (0, cols - w.shape[1])))

    w0, b0 = params["fr"][0]
    fused_w0 = jnp.concatenate(
        [pad2(w0, in_p, hid_p), pad2(params["gat_w"], in_p, hid_p)], axis=1
    ).astype(matmul_dtype)
    fused_b0 = jnp.concatenate(
        [pad2(b0, 1, hid_p), pad2(params["gat_b"], 1, hid_p)], axis=1
    ).astype(jnp.float32)

    packed = {
        "fused_w0": fused_w0,
        "fused_b0": fused_b0,
        "last_w": pad2(params["last_w"], hid_p, out_p).astype(matmul_dtype),
        "last_b": pad2(params["last_b"], 1, out_p).astype(jnp.float32),
        "lane_mask": (jnp.arange(hid_p) < hidden_size)
                     .astype(jnp.float32).reshape(1, hid_p),
    }
    if num_layer > 1:
        packed["fr_w"] = jnp.stack(
            [pad2(w, hid_p, hid_p) for w, _ in params["fr"][1:]]
        ).astype(matmul_dtype)
        packed["fr_b"] = jnp.stack(
            [pad2(b, 1, hid_p) for _, b in params["fr"][1:]]
        ).astype(jnp.float32)
    return packed


# ---------------------------------------------------------------------------
# Kernel
# ---------------------------------------------------------------------------

def _make_srnn_kernel(num_layer: int, hidden_pad: int, needs_mask: bool,
                      matmul_dtype):
    n_extra = num_layer - 1

    def kernel(*refs):
        it = iter(refs)
        x_ref = next(it)
        h_ref = next(it)
        fw0_ref = next(it)
        fb0_ref = next(it)
        frw_ref = next(it) if n_extra > 0 else None
        frb_ref = next(it) if n_extra > 0 else None
        last_w_ref = next(it)
        last_b_ref = next(it)
        mask_ref = next(it) if needs_mask else None
        y_ref = next(it)
        h_out_ref = next(it)

        # f32 -> bf16 cast happens here on the VPU (no wrapper pre-pass).
        x = x_ref[...].astype(matmul_dtype)                 # (TB, In_p)

        # Fused first fr layer + gate branch: one 2*H_p-wide MXU push on x.
        xw = jnp.dot(x, fw0_ref[...], preferred_element_type=jnp.float32)
        xw = xw + fb0_ref[...]                              # f32 bias add
        a = jnp.maximum(xw[:, :hidden_pad], 0.0)            # relu(fr layer 0)
        gate = jax.nn.sigmoid(xw[:, hidden_pad:])           # sigmoid(gate)

        for l in range(n_extra):                            # fr layers 1..L-1
            a = jnp.maximum(
                jnp.dot(a.astype(matmul_dtype), frw_ref[l],
                        preferred_element_type=jnp.float32) + frb_ref[l],
                0.0)

        # h @ wp == cyclic +1 shift of h along features.  The wrapper copies
        # h[:, H-1] into the last padded lane, so this single static rotate is
        # exact — no wrap patch.  No HxH weight, no MXU push.
        h = h_ref[...]                                      # (TB, H_p) f32
        h_shift = jnp.concatenate(
            [h[:, hidden_pad - 1:], h[:, :hidden_pad - 1]], axis=1)

        h_new = h_shift + a * gate                          # f32
        if needs_mask:
            # Zero padded feature lanes so the stored state stays clean
            # (single vmul against a resident (1, H_p) mask).
            h_new = h_new * mask_ref[...]

        y = jnp.dot(h_new.astype(matmul_dtype), last_w_ref[...],
                    preferred_element_type=jnp.float32) + last_b_ref[...]

        y_ref[...] = y.astype(y_ref.dtype)
        h_out_ref[...] = h_new.astype(h_out_ref.dtype)

    return kernel


# ---------------------------------------------------------------------------
# Wrapper
# ---------------------------------------------------------------------------

@functools.partial(jax.jit,
                   static_argnames=("input_size", "hidden_size", "num_layer",
                                    "output_size", "batch_tile", "out_dtype"))
def srnn_hidden_forward(x, h, packed, *, input_size, hidden_size, num_layer,
                        output_size, batch_tile=512, out_dtype=jnp.float32):
    """Fused SRNNHidden forward. `h` may be an array or None (-> zero history)."""
    assert num_layer >= 1
    batch = x.shape[0]
    x = x.reshape(batch, input_size).astype(jnp.float32)
    if h is None:
        h = jnp.zeros((batch, hidden_size), jnp.float32)   # 0 @ wp == 0
    h = h.astype(jnp.float32)

    in_p = packed["fused_w0"].shape[0]
    hid_p = packed["fused_w0"].shape[1] // 2
    out_p = packed["last_w"].shape[1]
    matmul_dtype = packed["fused_w0"].dtype
    needs_mask = hid_p != hidden_size

    # ---- batch tiling: sublane aligned; force >=2 blocks when batch allows it
    # (keeps the 2nd TensorCore busy on v7x; ~0.35us extra elsewhere).
    tb = min(_round_up(batch, _SUBLANE), _round_up(batch_tile, _SUBLANE))
    if batch >= 2 * _SUBLANE:
        tb = min(tb, _round_up((batch + 1) // 2, _SUBLANE))
    b_pad = _round_up(batch, tb)
    n_blocks = b_pad // tb

    # x stays f32 (cast to bf16 happens in-kernel); pad is a no-op when dims
    # are already aligned.
    x_p = jnp.pad(x, ((0, b_pad - batch), (0, in_p - input_size)))
    h_p = jnp.pad(h, ((0, b_pad - batch), (0, hid_p - hidden_size)))
    if needs_mask:
        # Duplicate h[:, H-1] into the last padded lane so the in-kernel
        # rotate-by-1 lands the correct wrap value at lane 0.
        h_p = h_p.at[:batch, hid_p - 1].set(h[:, hidden_size - 1])

    weights = [packed["fused_w0"], packed["fused_b0"]]
    if num_layer > 1:
        weights += [packed["fr_w"], packed["fr_b"]]
    weights += [packed["last_w"], packed["last_b"]]
    if needs_mask:
        weights.append(packed["lane_mask"])

    def batch_spec(cols):
        return pl.BlockSpec((tb, cols), lambda i: (i, 0))

    def resident(arr):
        # Constant index_map -> fetched once, stays in VMEM for the whole grid;
        # Buffered(1) -> single-buffered (no pointless second weight copy).
        zeros = (0,) * arr.ndim
        return pl.BlockSpec(arr.shape, lambda i: zeros,
                            pipeline_mode=pl.Buffered(1))

    # ---- VMEM budget: resident weights (single-buffered) + double-buffered
    # per-tile activations + f32 intermediates.  Floor 32 MiB (v5e default is
    # only 16 MiB), cap 56 MiB so it also fits v7x's 64 MiB physical VMEM.
    y_isize = jnp.dtype(out_dtype).itemsize
    weight_bytes = sum(int(a.size) * a.dtype.itemsize for a in weights)
    io_tile_bytes = tb * (in_p * 4 + hid_p * 4 + out_p * y_isize + hid_p * 4)
    interm_bytes = tb * hid_p * 4 * 6          # xw(2H), a, gate, h_shift, h_new
    est = weight_bytes + 2 * io_tile_bytes + interm_bytes
    vmem_limit = int(min(56 << 20, max(32 << 20, 2 * est + (2 << 20))))

    y_p, h_new_p = pl.pallas_call(
        _make_srnn_kernel(num_layer, hid_p, needs_mask, matmul_dtype),
        grid=(n_blocks,),
        in_specs=[batch_spec(in_p), batch_spec(hid_p)]
                 + [resident(a) for a in weights],
        out_specs=(batch_spec(out_p), batch_spec(hid_p)),
        out_shape=(jax.ShapeDtypeStruct((b_pad, out_p), out_dtype),
                   jax.ShapeDtypeStruct((b_pad, hid_p), jnp.float32)),
        compiler_params=pltpu.CompilerParams(
            dimension_semantics=("parallel",),
            vmem_limit_bytes=vmem_limit),
    )(x_p, h_p, *weights)

    return y_p[:batch, :output_size], h_new_p[:batch, :hidden_size]


# ---------------------------------------------------------------------------
# Pure-JAX reference (f32, dense wp matmul — mirrors the PyTorch module)
# ---------------------------------------------------------------------------

def _reference_forward(x, h, params, hidden_size):
    x = x.reshape(x.shape[0], params["gat_w"].shape[0]).astype(jnp.float32)
    eye = jnp.eye(hidden_size, dtype=jnp.float32)
    wp = jnp.concatenate([eye[1:], eye[0:1]], axis=0)
    a = x
    for w, b in params["fr"]:
        a = jnp.maximum(a @ w + b, 0.0)
    gate = jax.nn.sigmoid(x @ params["gat_w"] + params["gat_b"])
    if h is None:
        h_new = a * gate
    else:
        h_new = h @ wp + a * gate
    y = h_new @ params["last_w"] + params["last_b"]
    return y, h_new


if __name__ == "__main__":
    import numpy as np

    # Config A: padded feature lanes (H=32), 2 fr layers, single grid block.
    # Config B: lane-aligned H (=128), 1 fr layer, ragged batch -> 2 grid blocks.
    configs = [
        dict(input_size=16, hidden_size=32, num_layer=2, output_size=8, batch=8),
        dict(input_size=8, hidden_size=128, num_layer=1, output_size=4, batch=20),
    ]

    key = jax.random.PRNGKey(0)
    for cfg in configs:
        key, k_params, k_x, k_h = jax.random.split(key, 4)
        params = init_srnn_params(k_params, cfg["input_size"], cfg["hidden_size"],
                                  cfg["num_layer"], cfg["output_size"])
        packed = pack_srnn_params(params, input_size=cfg["input_size"],
                                  hidden_size=cfg["hidden_size"],
                                  num_layer=cfg["num_layer"],
                                  output_size=cfg["output_size"])

        x = jax.random.normal(k_x, (cfg["batch"], cfg["input_size"]), jnp.float32)
        h_prev = jax.random.normal(k_h, (cfg["batch"], cfg["hidden_size"]),
                                   jnp.float32)

        fwd = functools.partial(srnn_hidden_forward,
                                input_size=cfg["input_size"],
                                hidden_size=cfg["hidden_size"],
                                num_layer=cfg["num_layer"],
                                output_size=cfg["output_size"])

        # Case 1: first step (h = None) ; Case 2: recurrent step with given h.
        y0, h0 = fwd(x, None, packed)
        y1, h1 = fwd(x, h_prev, packed)
        jax.block_until_ready((y0, h0, y1, h1))

        ry0, rh0 = _reference_forward(x, None, params, cfg["hidden_size"])
        ry1, rh1 = _reference_forward(x, h_prev, params, cfg["hidden_size"])

        # bf16 matmul operands (f32 accumulation) -> loosened tolerance vs f32.
        for got, want in ((y0, ry0), (h0, rh0), (y1, ry1), (h1, rh1)):
            np.testing.assert_allclose(np.asarray(got), np.asarray(want),
                                       rtol=5e-2, atol=5e-2)

    print("KERNEL_OK")
</pallas_src>

<mosaic_0001>
module attributes {stable_mosaic.version = 11 : i64} {
  func.func @kernel(%arg0: i32, %arg1: memref<8x128xf32, #tpu.memory_space<vmem>>, %arg2: memref<8x128xf32, #tpu.memory_space<vmem>>, %arg3: memref<128x256xbf16, #tpu.memory_space<vmem>>, %arg4: memref<1x256xf32, #tpu.memory_space<vmem>>, %arg5: memref<1x128x128xbf16, #tpu.memory_space<vmem>>, %arg6: memref<1x1x128xf32, #tpu.memory_space<vmem>>, %arg7: memref<128x128xbf16, #tpu.memory_space<vmem>>, %arg8: memref<1x128xf32, #tpu.memory_space<vmem>>, %arg9: memref<1x128xf32, #tpu.memory_space<vmem>>, %arg10: memref<8x128xf32, #tpu.memory_space<vmem>>, %arg11: memref<8x128xf32, #tpu.memory_space<vmem>>) attributes {dimension_semantics = [#tpu.dimension_semantics<parallel>], iteration_bounds = array<i64: 1>, scalar_prefetch = 0 : i64, scratch_operands = 0 : i64, tpu.core_type = #tpu.core_type<tc>, window_params = [{transform_indices = @transform_0, window_bounds = array<i64: 8, 128>}, {transform_indices = @transform_1, window_bounds = array<i64: 8, 128>}, {pipeline_mode = #tpu.pipeline_mode<synchronous>, transform_indices = @transform_2, window_bounds = array<i64: 128, 256>}, {pipeline_mode = #tpu.pipeline_mode<synchronous>, transform_indices = @transform_3, window_bounds = array<i64: 1, 256>}, {pipeline_mode = #tpu.pipeline_mode<synchronous>, transform_indices = @transform_4, window_bounds = array<i64: 1, 128, 128>}, {pipeline_mode = #tpu.pipeline_mode<synchronous>, transform_indices = @transform_5, window_bounds = array<i64: 1, 1, 128>}, {pipeline_mode = #tpu.pipeline_mode<synchronous>, transform_indices = @transform_6, window_bounds = array<i64: 128, 128>}, {pipeline_mode = #tpu.pipeline_mode<synchronous>, transform_indices = @transform_7, window_bounds = array<i64: 1, 128>}, {pipeline_mode = #tpu.pipeline_mode<synchronous>, transform_indices = @transform_8, window_bounds = array<i64: 1, 128>}, {transform_indices = @transform_9, window_bounds = array<i64: 8, 128>}, {transform_indices = @transform_10, window_bounds = array<i64: 8, 128>}]} {
    %c0 = arith.constant 0 : index
    %c0_0 = arith.constant 0 : index
    %0 = vector.load %arg1[%c0, %c0_0] : memref<8x128xf32, #tpu.memory_space<vmem>>, vector<8x128xf32>
    %1 = arith.truncf %0 : vector<8x128xf32> to vector<8x128xbf16>
    %c0_1 = arith.constant 0 : index
    %c0_2 = arith.constant 0 : index
    %2 = vector.load %arg3[%c0_1, %c0_2] : memref<128x256xbf16, #tpu.memory_space<vmem>>, vector<128x256xbf16>
    %cst = arith.constant dense<0.000000e+00> : vector<8x256xf32>
    %3 = tpu.matmul %1, %2, %cst {dimension_numbers = #tpu.dot_dimension_numbers<[1], [0], [0], [1], [0, 0, 1, 1], [], []>} : vector<8x128xbf16>, vector<128x256xbf16>, vector<8x256xf32> -> vector<8x256xf32>
    %c0_3 = arith.constant 0 : index
    %c0_4 = arith.constant 0 : index
    %4 = vector.load %arg4[%c0_3, %c0_4] : memref<1x256xf32, #tpu.memory_space<vmem>>, vector<1x256xf32>
    %5 = vector.broadcast %4 : vector<1x256xf32> to vector<8x256xf32>
    %6 = arith.addf %3, %5 : vector<8x256xf32>
    %7 = vector.extract_strided_slice %6 {offsets = [0, 0], sizes = [8, 128], strides = [1, 1]} : vector<8x256xf32> to vector<8x128xf32>
    %cst_5 = arith.constant 0.000000e+00 : f32
    %8 = vector.broadcast %cst_5 : f32 to vector<8x128xf32>
    %9 = arith.maximumf %7, %8 : vector<8x128xf32>
    %10 = vector.extract_strided_slice %6 {offsets = [0, 128], sizes = [8, 128], strides = [1, 1]} : vector<8x256xf32> to vector<8x128xf32>
    %11 = arith.negf %10 : vector<8x128xf32>
    %12 = math.exp %11 : vector<8x128xf32>
    %cst_6 = arith.constant 1.000000e+00 : f32
    %13 = vector.broadcast %cst_6 : f32 to vector<8x128xf32>
    %14 = arith.addf %13, %12 : vector<8x128xf32>
    %15 = arith.divf %13, %14 : vector<8x128xf32>
    %16 = arith.truncf %9 : vector<8x128xf32> to vector<8x128xbf16>
    %c0_7 = arith.constant 0 : index
    %c0_8 = arith.constant 0 : index
    %c0_9 = arith.constant 0 : index
    %17 = vector.load %arg5[%c0_7, %c0_8, %c0_9] : memref<1x128x128xbf16, #tpu.memory_space<vmem>>, vector<1x128x128xbf16>
    %18 = vector.shape_cast %17 : vector<1x128x128xbf16> to vector<128x128xbf16>
    %cst_10 = arith.constant dense<0.000000e+00> : vector<8x128xf32>
    %19 = tpu.matmul %16, %18, %cst_10 {dimension_numbers = #tpu.dot_dimension_numbers<[1], [0], [0], [1], [0, 0, 1, 1], [], []>} : vector<8x128xbf16>, vector<128x128xbf16>, vector<8x128xf32> -> vector<8x128xf32>
    %c0_11 = arith.constant 0 : index
    %c0_12 = arith.constant 0 : index
    %c0_13 = arith.constant 0 : index
    %20 = vector.load %arg6[%c0_11, %c0_12, %c0_13] : memref<1x1x128xf32, #tpu.memory_space<vmem>>, vector<1x1x128xf32>
    %21 = vector.shape_cast %20 : vector<1x1x128xf32> to vector<1x128xf32>
    %22 = vector.broadcast %21 : vector<1x128xf32> to vector<8x128xf32>
    %23 = arith.addf %19, %22 : vector<8x128xf32>
    %cst_14 = arith.constant 0.000000e+00 : f32
    %24 = vector.broadcast %cst_14 : f32 to vector<8x128xf32>
    %25 = arith.maximumf %23, %24 : vector<8x128xf32>
    %c0_15 = arith.constant 0 : index
    %c0_16 = arith.constant 0 : index
    %26 = vector.load %arg2[%c0_15, %c0_16] : memref<8x128xf32, #tpu.memory_space<vmem>>, vector<8x128xf32>
    %27 = vector.extract_strided_slice %26 {offsets = [0, 127], sizes = [8, 1], strides = [1, 1]} : vector<8x128xf32> to vector<8x1xf32>
    %28 = vector.extract_strided_slice %26 {offsets = [0, 0], sizes = [8, 127], strides = [1, 1]} : vector<8x128xf32> to vector<8x127xf32>
    %29 = tpu.concatenate %27, %28 in 1 : vector<8x1xf32>, vector<8x127xf32> -> vector<8x128xf32>
    %30 = arith.mulf %25, %15 : vector<8x128xf32>
    %31 = arith.addf %29, %30 : vector<8x128xf32>
    %c0_17 = arith.constant 0 : index
    %c0_18 = arith.constant 0 : index
    %32 = vector.load %arg9[%c0_17, %c0_18] : memref<1x128xf32, #tpu.memory_space<vmem>>, vector<1x128xf32>
    %33 = vector.broadcast %32 : vector<1x128xf32> to vector<8x128xf32>
    %34 = arith.mulf %31, %33 : vector<8x128xf32>
    %35 = arith.truncf %34 : vector<8x128xf32> to vector<8x128xbf16>
    %c0_19 = arith.constant 0 : index
    %c0_20 = arith.constant 0 : index
    %36 = vector.load %arg7[%c0_19, %c0_20] : memref<128x128xbf16, #tpu.memory_space<vmem>>, vector<128x128xbf16>
    %cst_21 = arith.constant dense<0.000000e+00> : vector<8x128xf32>
    %37 = tpu.matmul %35, %36, %cst_21 {dimension_numbers = #tpu.dot_dimension_numbers<[1], [0], [0], [1], [0, 0, 1, 1], [], []>} : vector<8x128xbf16>, vector<128x128xbf16>, vector<8x128xf32> -> vector<8x128xf32>
    %c0_22 = arith.constant 0 : index
    %c0_23 = arith.constant 0 : index
    %38 = vector.load %arg8[%c0_22, %c0_23] : memref<1x128xf32, #tpu.memory_space<vmem>>, vector<1x128xf32>
    %39 = vector.broadcast %38 : vector<1x128xf32> to vector<8x128xf32>
    %40 = arith.addf %37, %39 : vector<8x128xf32>
    %c0_24 = arith.constant 0 : index
    %c0_25 = arith.constant 0 : index
    %41 = vector.load %arg10[%c0_24, %c0_25] : memref<8x128xf32, #tpu.memory_space<vmem>>, vector<8x128xf32>
    tpu.vector_store %arg10[%c0_24, %c0_25], %40 {strides = array<i32>} : memref<8x128xf32, #tpu.memory_space<vmem>>, vector<8x128xf32>,
    %c0_26 = arith.constant 0 : index
    %c0_27 = arith.constant 0 : index
    %42 = vector.load %arg11[%c0_26, %c0_27] : memref<8x128xf32, #tpu.memory_space<vmem>>, vector<8x128xf32>
    tpu.vector_store %arg11[%c0_26, %c0_27], %34 {strides = array<i32>} : memref<8x128xf32, #tpu.memory_space<vmem>>, vector<8x128xf32>,
    return
  }
  func.func @transform_0(%arg0: i32) -> (i32, i32) {
    %c0_i32 = arith.constant 0 : i32
    %c0_i32_0 = arith.constant 0 : i32
    return %arg0, %c0_i32 : i32, i32
  }
  func.func @transform_1(%arg0: i32) -> (i32, i32) {
    %c0_i32 = arith.constant 0 : i32
    %c0_i32_0 = arith.constant 0 : i32
    return %arg0, %c0_i32 : i32, i32
  }
  func.func @transform_2(%arg0: i32) -> (i32, i32) {
    %c0_i32 = arith.constant 0 : i32
    %c0_i32_0 = arith.constant 0 : i32
    %c0_i32_1 = arith.constant 0 : i32
    return %c0_i32, %c0_i32_0 : i32, i32
  }
  func.func @transform_3(%arg0: i32) -> (i32, i32) {
    %c0_i32 = arith.constant 0 : i32
    %c0_i32_0 = arith.constant 0 : i32
    %c0_i32_1 = arith.constant 0 : i32
    return %c0_i32, %c0_i32_0 : i32, i32
  }
  func.func @transform_4(%arg0: i32) -> (i32, i32, i32) {
    %c0_i32 = arith.constant 0 : i32
    %c0_i32_0 = arith.constant 0 : i32
    %c0_i32_1 = arith.constant 0 : i32
    %c0_i32_2 = arith.constant 0 : i32
    return %c0_i32, %c0_i32_0, %c0_i32_1 : i32, i32, i32
  }
  func.func @transform_5(%arg0: i32) -> (i32, i32, i32) {
    %c0_i32 = arith.constant 0 : i32
    %c0_i32_0 = arith.constant 0 : i32
    %c0_i32_1 = arith.constant 0 : i32
    %c0_i32_2 = arith.constant 0 : i32
    return %c0_i32, %c0_i32_0, %c0_i32_1 : i32, i32, i32
  }
  func.func @transform_6(%arg0: i32) -> (i32, i32) {
    %c0_i32 = arith.constant 0 : i32
    %c0_i32_0 = arith.constant 0 : i32
    %c0_i32_1 = arith.constant 0 : i32
    return %c0_i32, %c0_i32_0 : i32, i32
  }
  func.func @transform_7(%arg0: i32) -> (i32, i32) {
    %c0_i32 = arith.constant 0 : i32
    %c0_i32_0 = arith.constant 0 : i32
    %c0_i32_1 = arith.constant 0 : i32
    return %c0_i32, %c0_i32_0 : i32, i32
  }
  func.func @transform_8(%arg0: i32) -> (i32, i32) {
    %c0_i32 = arith.constant 0 : i32
    %c0_i32_0 = arith.constant 0 : i32
    %c0_i32_1 = arith.constant 0 : i32
    return %c0_i32, %c0_i32_0 : i32, i32
  }
  func.func @transform_9(%arg0: i32) -> (i32, i32) {
    %c0_i32 = arith.constant 0 : i32
    %c0_i32_0 = arith.constant 0 : i32
    return %arg0, %c0_i32 : i32, i32
  }
  func.func @transform_10(%arg0: i32) -> (i32, i32) {
    %c0_i32 = arith.constant 0 : i32
    %c0_i32_0 = arith.constant 0 : i32
    return %arg0, %c0_i32 : i32, i32
  }
}

</mosaic_0001>

<bundles_post_ra>
// kernel: srnn_hidden_forward.1
= control target key start
LH: loop header
LB: loop body
LE: loop exit
PB: predicated region body
PF: predicated region fallthrough
CT: control target
= control target key end

     0   :  { %16 = vsyncpa [#allocation3], 0  ;;  %s850_s0 = inlined_call_operand.vmem [shape: f32[8,128], index: 0, kind: input, shape index: {}]   ;;  %s851_s1 = inlined_call_operand.vmem [shape: f32[8,128], index: 1, kind: input, shape index: {}]   ;;  %s852_s2 = inlined_call_operand.hbm [shape: bf16[128,256], index: 2, kind: input, shape index: {}]   ;;  %s853_s3 = inlined_call_operand.vmem [shape: f32[1,256], index: 3, kind: input, shape index: {}]   ;;  %s854_s4 = inlined_call_operand.hbm [shape: bf16[1,128,128], index: 4, kind: input, shape index: {}]   ;;  %s855_s5 = inlined_call_operand.vmem [shape: f32[1,1,128], index: 5, kind: input, shape index: {}]   ;;  %s856_s6 = inlined_call_operand.hbm [shape: bf16[128,128], index: 6, kind: input, shape index: {}]   ;;  %s857_s7 = inlined_call_operand.vmem [shape: f32[1,128], index: 7, kind: input, shape index: {}]   ;;  %s858_s8 = inlined_call_operand.vmem [shape: f32[1,128], index: 8, kind: input, shape index: {}]   ;;  %s859_s9 = inlined_call_operand.hbm [shape: f32[8,128], index: 9, kind: output, shape index: {0}]   ;;  %s860_s10 = inlined_call_operand.hbm [shape: f32[8,128], index: 10, kind: output, shape index: {1}]  }
   0x1   :  { %17 = vsyncpa [#allocation6], 0 }
   0x2   :  { %18 = vsyncpa [#allocation4], 0  ;;  %s43_s15 = sshll.u32 %s854_s4, 4  ;;  %s44_s15 = int_to_ptr.hbm [resolvable:$true] %s43_s15 }
   0x3   :  { %19 = vsyncpa [#allocation10], 0  ;;  %s752_s16 = smov [#allocation5]   ;;  %s28_s20 = sshll.u32 %s852_s2, 4  ;;  %s29_s20 = int_to_ptr.hbm [resolvable:$true] %s28_s20 }
   0x4   :  { %s45_s17 = sshll.u32 %s752_s16, 4  ;;  %s753_s21 = smov 64   ;;  %s46_s17 = int_to_ptr.vmem [resolvable:$true] %s45_s17 }
   0x5   :  { %s754_s22 = smov 4   ;;  %s755_s23 = smov [#allocation2]  }
   0x6   :  { %51 = dma.hbm_to_vmem [thread:$0]  %s44_s15, 1024, %s46_s17, [#allocation6], %s753_s21, %s753_s21, %s754_s22  }
   0x7   :  { %s30_s24 = sshll.u32 %s755_s23, 4  ;;  %s756_s25 = smov 128   ;;  %s31_s24 = int_to_ptr.vmem [resolvable:$true] %s30_s24 }
   0x8   :  { %s757_s26 = smov 8   ;;  %s58_s28 = sshll.u32 %s856_s6, 4  ;;  %s59_s28 = int_to_ptr.hbm [resolvable:$true] %s58_s28 }
   0x9   :  { %36 = dma.hbm_to_vmem [thread:$0]  %s29_s20, 2048, %s31_s24, [#allocation3], %s756_s25, %s756_s25, %s757_s26  }
   0xa   :  { %s758_s29 = smov [#allocation7]  }
   0xb   :  { %s60_s30 = sshll.u32 %s758_s29, 4  ;;  %s61_s30 = int_to_ptr.vmem [resolvable:$true] %s60_s30 }
   0xc   :  { %66 = dma.hbm_to_vmem [thread:$0]  %s59_s28, 1024, %s61_s30, [#allocation6], %s753_s21, %s753_s21, %s754_s22  }
   0xd   :  { %744 = dma.done.wait [#allocation3], 2048  }
   0xe   :  { %745 = vsyncadd [#allocation3], 4294965248 }
   0xf   :  { %746 = dma.done.wait [#allocation6], 2048  }
  0x10   :  { %747 = vsyncadd [#allocation6], 4294965248  ;;  %v504_v0 = vld [vmem:[#allocation2 + $0x70] sm:$0xf]  ;;  %v590_v1 = vld [vmem:[#allocation2 + $0x74] sm:$0xf0] }
  0x11   :  { %v496_v2 = vld [vmem:[#allocation2 + $0x60] sm:$0xf]  ;;  %v505_v3 = vor.u32 %v590_v1, %v504_v0  ;;  %v588_v4 = vld [vmem:[#allocation2 + $0x64] sm:$0xf0]  ;;  %v488_v6 = vld [vmem:[#allocation2 + $0x50] sm:$0xf] }
  0x12   :  { %v497_v5 = vor.u32 %v588_v4, %v496_v2  ;;  %v586_v7 = vld [vmem:[#allocation2 + $0x54] sm:$0xf0]  ;;  %v589_v8 = vld [vmem:[#allocation2 + $0x74] sm:$0xf]  ;;  %v506_v9 = vld [vmem:[#allocation2 + $0x78] sm:$0xf0] }
  0x13   :  { %187 = vmatpush.bf16.msra.mxu0 %v505_v3  ;;  %v587_v10 = vld [vmem:[#allocation2 + $0x64] sm:$0xf]  ;;  %v498_v11 = vld [vmem:[#allocation2 + $0x68] sm:$0xf0]  ;;  %v489_v12 = vor.u32 %v586_v7, %v488_v6  ;;  %v509_v13 = vor.u32 %v589_v8, %v506_v9  ;;  %v480_v14 = vld [vmem:[#allocation2 + $0x40] sm:$0xf] }
  0x14   :  { %v584_v15 = vld [vmem:[#allocation2 + $0x44] sm:$0xf0]  ;;  %v501_v16 = vor.u32 %v587_v10, %v498_v11  ;;  %v585_v17 = vld [vmem:[#allocation2 + $0x54] sm:$0xf]  ;;  %v490_v18 = vld [vmem:[#allocation2 + $0x58] sm:$0xf0] }
  0x15   :  { %200 = vmatpush.bf16.msra.mxu1 %v509_v13  ;;  %v481_v19 = vor.u32 %v584_v15, %v480_v14  ;;  %v598_v20 = vld [vmem:[#allocation5 + $0x38] sm:$0xff]  ;;  %v472_v21 = vld [vmem:[#allocation2 + $0x30] sm:$0xf]  ;;  %v493_v23 = vor.u32 %v585_v17, %v490_v18  ;;  %v583_v25 = vld [vmem:[#allocation2 + $0x44] sm:$0xf]  ;;  %s759_s12 = smov 1  }
  0x16   :  { %v582_v22 = vld [vmem:[#allocation2 + $0x34] sm:$0xf0]  ;;  %302 = vmatpush.bf16.msra.mxu2 %v598_v20  ;;  %v597_v24 = vld [vmem:[#allocation5 + $0x30] sm:$0xff]  ;;  %v482_v26 = vld [vmem:[#allocation2 + $0x48] sm:$0xf0]  ;;  %s430_s20 = sshll.u32 %s860_s10, 4  ;;  %s431_s20 = int_to_ptr.hbm [resolvable:$true] %s430_s20 }
  0x17   :  { %188 = vmatpush.bf16.msra.mxu0 %v497_v5  ;;  %v473_v27 = vor.u32 %v582_v22, %v472_v21  ;;  %v464_v28 = vld [vmem:[#allocation2 + $0x20] sm:$0xf]  ;;  %v580_v29 = vld [vmem:[#allocation2 + $0x24] sm:$0xf0]  ;;  %v485_v30 = vor.u32 %v583_v25, %v482_v26  ;;  %v581_v32 = vld [vmem:[#allocation2 + $0x34] sm:$0xf] }
  0x18   :  { %v596_v31 = vld [vmem:[#allocation5 + $0x28] sm:$0xff]  ;;  %v474_v33 = vld [vmem:[#allocation2 + $0x38] sm:$0xf0]  ;;  %v465_v34 = vor.u32 %v580_v29, %v464_v28  ;;  %v456_v35 = vld [vmem:[#allocation2 + $0x10] sm:$0xf]  ;;  %s419_s26 = sshll.u32 %s859_s9, 4  ;;  %s420_s26 = int_to_ptr.hbm [resolvable:$true] %s419_s26 }
  0x19   :  { %201 = vmatpush.bf16.msra.mxu1 %v501_v16  ;;  %v578_v36 = vld [vmem:[#allocation2 + $0x14] sm:$0xf0]  ;;  %v477_v37 = vor.u32 %v581_v32, %v474_v33  ;;  %v595_v38 = vld [vmem:[#allocation5 + $0x20] sm:$0xff]  ;;  %v466_v40 = vld [vmem:[#allocation2 + $0x28] sm:$0xf0] }
  0x1a   :  { %303 = vmatpush.bf16.msra.mxu2 %v597_v24  ;;  %v579_v39 = vld [vmem:[#allocation2 + $0x24] sm:$0xf]  ;;  %v457_v41 = vor.u32 %v578_v36, %v456_v35  ;;  %v448_v42 = vld [vmem:[#allocation2] sm:$0xf]  ;;  %v576_v43 = vld [vmem:[#allocation2 + $0x4] sm:$0xf0] }
  0x1b   :  { %189 = vmatpush.bf16.msra.mxu0 %v489_v12  ;;  %v469_v44 = vor.u32 %v579_v39, %v466_v40  ;;  %v594_v45 = vld [vmem:[#allocation5 + $0x18] sm:$0xff]  ;;  %v577_v46 = vld [vmem:[#allocation2 + $0x14] sm:$0xf]  ;;  %v449_v48 = vor.u32 %v576_v43, %v448_v42  ;;  %v83_v49 = vld [vmem:[%s850_s0] sm:$0xff] }
  0x1c   :  { %v458_v47 = vld [vmem:[#allocation2 + $0x18] sm:$0xf0]  ;;  %v593_v51 = vld [vmem:[#allocation5 + $0x10] sm:$0xff]  ;;  %v84_v52 = vpack.c.bf16 %v83_v49, %v83_v49  ;;  %v575_v53 = vld [vmem:[#allocation2 + $0x4] sm:$0xf] }
  0x1d   :  { %202 = vmatpush.bf16.msra.mxu1 %v493_v23  ;;  %v461_v50 = vor.u32 %v577_v46, %v458_v47  ;;  %v450_v54 = vld [vmem:[#allocation2 + $0x8] sm:$0xf0]  ;;  %v591_v57 = vld [vmem:[#allocation5] sm:$0xff]  ;;  %v606_v59 = vld [vmem:[#allocation7 + $0x38] sm:$0xff] }
  0x1e   :  { %304 = vmatpush.bf16.msra.mxu2 %v596_v31  ;;  %v453_v55 = vor.u32 %v575_v53, %v450_v54  ;;  %v592_v56 = vld [vmem:[#allocation5 + $0x8] sm:$0xff]  ;;  %v316_v58 = vld [vmem:[%s851_s1] sm:$0xff]  ;;  %397 = vmatpush.bf16.msra.mxu3 %v606_v59  ;;  %v605_v60 = vld [vmem:[#allocation7 + $0x30] sm:$0xff] }
  0x1f   :  { %190 = vmatpush.bf16.msra.mxu0 %v481_v19  ;;  %318 = vrot.lane.b32.xlu0 %v316_v58, %s759_s12  ;;  %v101_v61 = vld [vmem:[%s853_s3] sm:$0x3]  ;;  %v604_v62 = vld [vmem:[#allocation7 + $0x28] sm:$0xff]  ;;  %v602_v3 = vld [vmem:[#allocation7 + $0x18] sm:$0xff] }
  0x20   :  { %v103_v63 = vperm.slane %v101_v61, 0  ;;  %v603_v0 = vld [vmem:[#allocation7 + $0x20] sm:$0xff]  ;;  %v104_v9 = vperm.slane %v101_v61, 1  ;;  %v601_v12 = vld [vmem:[#allocation7 + $0x10] sm:$0xff]  ;;  %v600_v15 = vld [vmem:[#allocation7 + $0x8] sm:$0xff] }
  0x21   :  { %203 = vmatpush.bf16.msra.mxu1 %v485_v30  ;;  %v599_v16 = vld [vmem:[#allocation7] sm:$0xff] }
  0x22   :  { %305 = vmatpush.bf16.msra.mxu2 %v595_v38  ;;  %398 = vmatpush.bf16.msra.mxu3 %v605_v60  ;;  %v617_v22 = vld [vmem:[%s855_s5] ss:$0 sm:$0xff]  ;;  %s760_s5 = smov [#allocation9]  }
  0x23   :  { %191 = vmatpush.bf16.msra.mxu0 %v473_v27  ;;  %v618_v33 = vld [vmem:[%s858_s8] ss:$0 sm:$0xff]  ;;  %s428_s17 = sshll.u32 %s760_s5, 4  ;;  %s761_s8 = smov [#allocation8]   ;;  %s429_s17 = int_to_ptr.vmem [resolvable:$true] %s428_s17 }
  0x24   :  { %v619_v38 = vld [vmem:[%s857_s7] ss:$0 sm:$0xff]  ;;  %s417_s23 = sshll.u32 %s761_s8, 4  ;;  %s418_s23 = int_to_ptr.vmem [resolvable:$true] %s417_s23 }
  0x25   :  { %204 = vmatpush.bf16.msra.mxu1 %v477_v37 }
  0x26   :  { %306 = vmatpush.bf16.msra.mxu2 %v594_v45  ;;  %399 = vmatpush.bf16.msra.mxu3 %v604_v62 }
  0x27   :  { %192 = vmatpush.bf16.msra.mxu0 %v465_v34 }
  0x29   :  { %205 = vmatpush.bf16.msra.mxu1 %v469_v44 }
  0x2a   :  { %307 = vmatpush.bf16.msra.mxu2 %v593_v51  ;;  %400 = vmatpush.bf16.msra.mxu3 %v603_v0 }
  0x2b   :  { %193 = vmatpush.bf16.msra.mxu0 %v457_v41 }
  0x2d   :  { %206 = vmatpush.bf16.msra.mxu1 %v461_v50 }
  0x2e   :  { %308 = vmatpush.bf16.msra.mxu2 %v592_v56  ;;  %401 = vmatpush.bf16.msra.mxu3 %v602_v3 }
  0x2f   :  { %194 = vmatpush.bf16.msra.mxu0 %v449_v48 }
  0x31   :  { %207 = vmatpush.bf16.msra.mxu1 %v453_v55 }
  0x32   :  { %195 = vmatmul.bf16.vlgmr.msra.gmra.mxu0 %v84_v52  ;;  %309 = vmatpush.bf16.msra.mxu2 %v591_v57 }
  0x33   :  { %402 = vmatpush.bf16.msra.mxu3 %v601_v12 }
  0x34   :  { %208 = vmatmul.bf16.vlgmr.msra.gmra.mxu1 %v84_v52 }
  0x37   :  { %403 = vmatpush.bf16.msra.mxu3 %v600_v15 }
  0x3b   :  { %404 = vmatpush.bf16.msra.mxu3 %v599_v16 }
  0x91   :  { %v319_v31 = vpop.permute.xlu0 %318 }
  0xaf   :  { %v196_v1 = vpop.f32.mrf.mxu0 }
  0xb0   :  { %v197_v2 = vadd.f32 %v196_v1, %v103_v63 }
  0xb1   :  { %v209_v6 = vpop.f32.mrf.mxu1 }
  0xb2   :  { %v213_v4 = vmax.f32 %v197_v2, 0.0  ;;  %v210_v10 = vadd.f32 %v209_v6, %v104_v9 }
  0xb4   :  { %v233_v5 = vpack.c.bf16 %v213_v4, %v213_v4  ;;  %v510_v11 = vmul.f32 -1.442695, %v210_v10 }
  0xb6   :  { %310 = vmatmul.bf16.vlgmr.msra.gmra.mxu2 %v233_v5  ;;  %620 = vpow2.f32 %v510_v11 }
  0xb7   :  { %v198_v7 = vpop.f32.mrf.mxu0 }
  0xb9   :  { %v211_v8 = vpop.f32.mrf.mxu1 }
  0xbc   :  { %v621_v13 = vpop.eup %620 }
  0xbd   :  { %v217_v14 = vadd.f32 1.0, %v621_v13 }
  0xbf   :  { %622 = vrcp.f32 %v217_v14  ;;  %vm223_vm0 = vweird.f32 %v217_v14  ;;  %v229_v21 = vand.u32 2147483648, %v217_v14  ;;  %v227_v24 = vand.u32 2147483647, %v217_v14 }
  0xc1   :  { %v230_v26 = vor.u32 1.1754944e-38, %v229_v21  ;;  %vm228_vm3 = vcmp.eq.f32.partialorder %v227_v24, 8.507059e+37 }
  0xc5   :  { %v623_v17 = vpop.eup %622 }
  0xc6   :  { %v219_v18 = vmul.f32 %v623_v17, %v217_v14  ;;  %vm224_vm1 = vweird.f32 %v623_v17 }
  0xc7   :  { %vm225_vm2 = vmor %vm223_vm0, %vm224_vm1 }
  0xc8   :  { %v220_v19 = vsub.f32 1.0, %v219_v18 }
  0xca   :  { %v221_v20 = vmul.f32 %v623_v17, %v220_v19 }
  0xcc   :  { %v222_v23 = vadd.f32 %v623_v17, %v221_v20 }
  0xce   :  { %v226_v28 = vsel %vm225_vm2, %v623_v17, %v222_v23 }
  0xcf   :  { %v231_v30 = vsel %vm228_vm3, %v230_v26, %v226_v28 }
 0x139   :  { %v311_v25 = vpop.f32.mrf.mxu2 }
 0x13a   :  { %v312_v27 = vadd.f32 %v617_v22, %v311_v25 }
 0x13c   :  { %v315_v29 = vmax.f32 %v312_v27, 0.0 }
 0x13e   :  { %v321_v32 = vmul.f32 %v315_v29, %v231_v30 }
 0x140   :  { %v322_v34 = vadd.f32 %v321_v32, %v319_v31 }
 0x141   :  { %v313_v35 = vpop.f32.mrf.mxu2 }
 0x142   :  { %v327_v36 = vmul.f32 %v618_v33, %v322_v34 }
 0x144   :  { %411 = vst [vmem:[#allocation9] sm:$0xff] %v327_v36  ;;  %v328_v37 = vpack.c.bf16 %v327_v36, %v327_v36 }
 0x145   :  { %433 = dma.vmem_to_hbm [thread:$0]  %s429_s17, 128, %s431_s20, [#allocation10]  }
 0x146   :  { %405 = vmatmul.bf16.vlgmr.msra.gmra.mxu3 %v328_v37 }
 0x1c9   :  { %v406_v39 = vpop.f32.mrf.mxu3 }
 0x1ca   :  { %v407_v40 = vadd.f32 %v619_v38, %v406_v39 }
 0x1cc   :  { %410 = vst [vmem:[#allocation8] sm:$0xff] %v407_v40 }
 0x1cd   :  { %422 = dma.vmem_to_hbm [thread:$0]  %s418_s23, 128, %s420_s26, [#allocation4]  }
 0x1d1   :  { %v408_v41 = vpop.f32.mrf.mxu3 }
 0x1d2   :  { %748 = dma.done.wait [#allocation4], 128  }
 0x1d3   :  { %749 = vsyncadd [#allocation4], 4294967168 }
 0x1d4   :  { %750 = dma.done.wait [#allocation10], 128  }
 0x1d5   :  { %751 = vsyncadd [#allocation10], 4294967168 }
 0x1d6   :  { %442 = vsyncpa [#allocation3], 1 }
 0x1d7   :  { %443 = vsyncpa [#allocation6], 1 }
 0x1d8   :  { %444 = vsyncpa [#allocation4], 1 }
 0x1d9   :  { %445 = vsyncpa [#allocation10], 1 }

</bundles_post_ra>
